<compile_context>
chip_gen: v7x
topology: tpu7x:2x2x1
jax: 0.10.0
libtpu: 0.0.40
codegen_flags: <defaults>
</compile_context>

<pallas_src>
import functools

import jax
import jax.numpy as jnp
from jax import lax
from jax.experimental import pallas as pl
from jax.experimental.pallas import tpu as pltpu


def _conv3x3_tanh_kernel(x_ref, w_ref, b_ref, o_ref, col_ref, *, N, C_in, Wp, L):
    # x_ref  : (N, C_in, FLAT)  bf16  zero-padded image, spatial dims flattened
    #                                 (row stride = Wp, FLAT >= (H+2)*Wp + 2).
    # w_ref  : (C_out, 9*C_in)  bf16  tap-major (t = kh*3 + kw), then channel.
    # b_ref  : (C_out, 1)       f32
    # o_ref  : (N, C_out, L)    f32   L = H*Wp; columns >= W of each image row
    #                                 are junk and sliced off by the wrapper.
    # col_ref: (9*C_in, N*L)    bf16  VMEM im2col scratch.
    for n in range(N):
        for t in range(9):
            kh, kw = divmod(t, 3)
            s = kh * Wp + kw                               # static flat shift
            col_ref[t * C_in:(t + 1) * C_in, n * L:(n + 1) * L] = \
                x_ref[n, :, s:s + L]

    # Single K = 9*C_in MXU contraction over the whole batch, f32 accumulate.
    acc = jnp.dot(w_ref[...], col_ref[...], preferred_element_type=jnp.float32)
    y = jnp.tanh(acc + b_ref[...])                         # (C_out, N*L) f32

    for n in range(N):
        o_ref[n] = y[:, n * L:(n + 1) * L].astype(o_ref.dtype)


def cd_encoder_forward(x_nchw, weight, bias):
    """Conv2d(k=3, s=1, p=1) + Tanh, matching PyTorch CD_encoder.forward.

    x_nchw : (N, C_in, H, W)
    weight : (C_out, C_in, 3, 3)  (PyTorch OIHW)
    bias   : (C_out,)
    returns: (N, C_out, H, W)
    """
    N, C_in, H, W = x_nchw.shape
    C_out = weight.shape[0]

    Wp = -(-(W + 2) // 8) * 8        # >= W+2; for H=16 makes L a multiple of 128
    L = H * Wp                       # per-image flattened output length
    FLAT = (H + 3) * Wp              # >= (H+2)*Wp + 2, covers largest tap shift

    # --- glue: one zero-pad, no transposes, no HBM im2col --------------------
    x_pad = jnp.pad(x_nchw, ((0, 0), (0, 0), (1, 2), (1, Wp - W - 1)))
    xf = x_pad.reshape(N, C_in, FLAT).astype(jnp.bfloat16)

    # weight (C_out, C_in, 3, 3) -> (C_out, 3, 3, C_in) -> (C_out, 9*C_in),
    # row ordering matches the im2col scratch rows (tap-major, then channel).
    w2 = jnp.transpose(weight, (0, 2, 3, 1)).reshape(C_out, 9 * C_in)
    w2 = w2.astype(jnp.bfloat16)
    b2 = bias.reshape(C_out, 1).astype(jnp.float32)

    cost = pl.CostEstimate(
        flops=2 * C_out * 9 * C_in * N * L,
        transcendentals=N * C_out * L,
        bytes_accessed=2 * (xf.size + w2.size) + 4 * (b2.size + N * C_out * L),
    )

    kernel = functools.partial(_conv3x3_tanh_kernel,
                               N=N, C_in=C_in, Wp=Wp, L=L)

    out = pl.pallas_call(
        kernel,
        out_shape=jax.ShapeDtypeStruct((N, C_out, L), jnp.float32),
        scratch_shapes=[pltpu.VMEM((9 * C_in, N * L), jnp.bfloat16)],
        cost_estimate=cost,
    )(xf, w2, b2)

    # (N, C_out, H, Wp) -> drop junk pad columns; already NCHW order.
    return out.reshape(N, C_out, H, Wp)[:, :, :, :W].astype(x_nchw.dtype)


def _reference(x_nchw, weight, bias):
    y = lax.conv_general_dilated(
        x_nchw, weight, window_strides=(1, 1), padding=((1, 1), (1, 1)),
        dimension_numbers=("NCHW", "OIHW", "NCHW"))
    return jnp.tanh(y + bias.reshape(1, -1, 1, 1))


if __name__ == "__main__":
    key = jax.random.PRNGKey(0)
    k_x, k_w, k_b = jax.random.split(key, 3)

    # module defaults: input_dim=32, output_dim=16
    N, C_in, H, W = 2, 32, 16, 16
    C_out = 16

    x = jax.random.normal(k_x, (N, C_in, H, W), dtype=jnp.float32)

    fan_in = C_in * 3 * 3
    bound = 1.0 / (fan_in ** 0.5)
    weight = jax.random.uniform(k_w, (C_out, C_in, 3, 3),
                                minval=-bound, maxval=bound, dtype=jnp.float32)
    bias = jax.random.uniform(k_b, (C_out,),
                              minval=-bound, maxval=bound, dtype=jnp.float32)

    fwd = jax.jit(cd_encoder_forward)
    out = jax.block_until_ready(fwd(x, weight, bias))

    ref = jax.block_until_ready(_reference(x, weight, bias))
    assert out.shape == (N, C_out, H, W)
    err = float(jnp.max(jnp.abs(out - ref)))
    # bf16 MXU operands with f32 accumulation: expected max |err| ~ few 1e-3.
    assert err < 2e-2, f"mismatch vs reference conv: max abs err = {err}"

    print("KERNEL_OK")
</pallas_src>

<mosaic_0001>
module attributes {stable_mosaic.version = 11 : i64} {
  func.func @_conv3x3_tanh_kernel(%arg0: memref<2x32x456xbf16, #tpu.memory_space<vmem>>, %arg1: memref<16x288xbf16, #tpu.memory_space<vmem>>, %arg2: memref<16x1xf32, #tpu.memory_space<vmem>>, %arg3: memref<2x16x384xf32, #tpu.memory_space<vmem>>, %arg4: memref<288x768xbf16, #tpu.memory_space<vmem>>) attributes {dimension_semantics = [], scalar_prefetch = 0 : i64, scratch_operands = 1 : i64, tpu.core_type = #tpu.core_type<tc>} {
    %c0 = arith.constant 0 : index
    %c0_0 = arith.constant 0 : index
    %c0_1 = arith.constant 0 : index
    %0 = vector.load %arg0[%c0, %c0_0, %c0_1] : memref<2x32x456xbf16, #tpu.memory_space<vmem>>, vector<1x32x384xbf16>
    %1 = vector.shape_cast %0 : vector<1x32x384xbf16> to vector<32x384xbf16>
    %c0_2 = arith.constant 0 : index
    %c0_3 = arith.constant 0 : index
    %2 = vector.load %arg4[%c0_2, %c0_3] : memref<288x768xbf16, #tpu.memory_space<vmem>>, vector<32x384xbf16>
    tpu.vector_store %arg4[%c0_2, %c0_3], %1 {strides = array<i32>} : memref<288x768xbf16, #tpu.memory_space<vmem>>, vector<32x384xbf16>,
    %c0_4 = arith.constant 0 : index
    %c0_5 = arith.constant 0 : index
    %c1 = arith.constant 1 : index
    %3 = vector.load %arg0[%c0_4, %c0_5, %c1] : memref<2x32x456xbf16, #tpu.memory_space<vmem>>, vector<1x32x384xbf16>
    %4 = vector.shape_cast %3 : vector<1x32x384xbf16> to vector<32x384xbf16>
    %c32 = arith.constant 32 : index
    %c0_6 = arith.constant 0 : index
    %5 = vector.load %arg4[%c32, %c0_6] : memref<288x768xbf16, #tpu.memory_space<vmem>>, vector<32x384xbf16>
    tpu.vector_store %arg4[%c32, %c0_6], %4 {strides = array<i32>} : memref<288x768xbf16, #tpu.memory_space<vmem>>, vector<32x384xbf16>,
    %c0_7 = arith.constant 0 : index
    %c0_8 = arith.constant 0 : index
    %c2 = arith.constant 2 : index
    %6 = vector.load %arg0[%c0_7, %c0_8, %c2] : memref<2x32x456xbf16, #tpu.memory_space<vmem>>, vector<1x32x384xbf16>
    %7 = vector.shape_cast %6 : vector<1x32x384xbf16> to vector<32x384xbf16>
    %c64 = arith.constant 64 : index
    %c0_9 = arith.constant 0 : index
    %8 = vector.load %arg4[%c64, %c0_9] : memref<288x768xbf16, #tpu.memory_space<vmem>>, vector<32x384xbf16>
    tpu.vector_store %arg4[%c64, %c0_9], %7 {strides = array<i32>} : memref<288x768xbf16, #tpu.memory_space<vmem>>, vector<32x384xbf16>,
    %c0_10 = arith.constant 0 : index
    %c0_11 = arith.constant 0 : index
    %c24 = arith.constant 24 : index
    %9 = vector.load %arg0[%c0_10, %c0_11, %c24] : memref<2x32x456xbf16, #tpu.memory_space<vmem>>, vector<1x32x384xbf16>
    %10 = vector.shape_cast %9 : vector<1x32x384xbf16> to vector<32x384xbf16>
    %c96 = arith.constant 96 : index
    %c0_12 = arith.constant 0 : index
    %11 = vector.load %arg4[%c96, %c0_12] : memref<288x768xbf16, #tpu.memory_space<vmem>>, vector<32x384xbf16>
    tpu.vector_store %arg4[%c96, %c0_12], %10 {strides = array<i32>} : memref<288x768xbf16, #tpu.memory_space<vmem>>, vector<32x384xbf16>,
    %c0_13 = arith.constant 0 : index
    %c0_14 = arith.constant 0 : index
    %c25 = arith.constant 25 : index
    %12 = vector.load %arg0[%c0_13, %c0_14, %c25] : memref<2x32x456xbf16, #tpu.memory_space<vmem>>, vector<1x32x384xbf16>
    %13 = vector.shape_cast %12 : vector<1x32x384xbf16> to vector<32x384xbf16>
    %c128 = arith.constant 128 : index
    %c0_15 = arith.constant 0 : index
    %14 = vector.load %arg4[%c128, %c0_15] : memref<288x768xbf16, #tpu.memory_space<vmem>>, vector<32x384xbf16>
    tpu.vector_store %arg4[%c128, %c0_15], %13 {strides = array<i32>} : memref<288x768xbf16, #tpu.memory_space<vmem>>, vector<32x384xbf16>,
    %c0_16 = arith.constant 0 : index
    %c0_17 = arith.constant 0 : index
    %c26 = arith.constant 26 : index
    %15 = vector.load %arg0[%c0_16, %c0_17, %c26] : memref<2x32x456xbf16, #tpu.memory_space<vmem>>, vector<1x32x384xbf16>
    %16 = vector.shape_cast %15 : vector<1x32x384xbf16> to vector<32x384xbf16>
    %c160 = arith.constant 160 : index
    %c0_18 = arith.constant 0 : index
    %17 = vector.load %arg4[%c160, %c0_18] : memref<288x768xbf16, #tpu.memory_space<vmem>>, vector<32x384xbf16>
    tpu.vector_store %arg4[%c160, %c0_18], %16 {strides = array<i32>} : memref<288x768xbf16, #tpu.memory_space<vmem>>, vector<32x384xbf16>,
    %c0_19 = arith.constant 0 : index
    %c0_20 = arith.constant 0 : index
    %c48 = arith.constant 48 : index
    %18 = vector.load %arg0[%c0_19, %c0_20, %c48] : memref<2x32x456xbf16, #tpu.memory_space<vmem>>, vector<1x32x384xbf16>
    %19 = vector.shape_cast %18 : vector<1x32x384xbf16> to vector<32x384xbf16>
    %c192 = arith.constant 192 : index
    %c0_21 = arith.constant 0 : index
    %20 = vector.load %arg4[%c192, %c0_21] : memref<288x768xbf16, #tpu.memory_space<vmem>>, vector<32x384xbf16>
    tpu.vector_store %arg4[%c192, %c0_21], %19 {strides = array<i32>} : memref<288x768xbf16, #tpu.memory_space<vmem>>, vector<32x384xbf16>,
    %c0_22 = arith.constant 0 : index
    %c0_23 = arith.constant 0 : index
    %c49 = arith.constant 49 : index
    %21 = vector.load %arg0[%c0_22, %c0_23, %c49] : memref<2x32x456xbf16, #tpu.memory_space<vmem>>, vector<1x32x384xbf16>
    %22 = vector.shape_cast %21 : vector<1x32x384xbf16> to vector<32x384xbf16>
    %c224 = arith.constant 224 : index
    %c0_24 = arith.constant 0 : index
    %23 = vector.load %arg4[%c224, %c0_24] : memref<288x768xbf16, #tpu.memory_space<vmem>>, vector<32x384xbf16>
    tpu.vector_store %arg4[%c224, %c0_24], %22 {strides = array<i32>} : memref<288x768xbf16, #tpu.memory_space<vmem>>, vector<32x384xbf16>,
    %c0_25 = arith.constant 0 : index
    %c0_26 = arith.constant 0 : index
    %c50 = arith.constant 50 : index
    %24 = vector.load %arg0[%c0_25, %c0_26, %c50] : memref<2x32x456xbf16, #tpu.memory_space<vmem>>, vector<1x32x384xbf16>
    %25 = vector.shape_cast %24 : vector<1x32x384xbf16> to vector<32x384xbf16>
    %c256 = arith.constant 256 : index
    %c0_27 = arith.constant 0 : index
    %26 = vector.load %arg4[%c256, %c0_27] : memref<288x768xbf16, #tpu.memory_space<vmem>>, vector<32x384xbf16>
    tpu.vector_store %arg4[%c256, %c0_27], %25 {strides = array<i32>} : memref<288x768xbf16, #tpu.memory_space<vmem>>, vector<32x384xbf16>,
    %c1_28 = arith.constant 1 : index
    %c0_29 = arith.constant 0 : index
    %c0_30 = arith.constant 0 : index
    %27 = vector.load %arg0[%c1_28, %c0_29, %c0_30] : memref<2x32x456xbf16, #tpu.memory_space<vmem>>, vector<1x32x384xbf16>
    %28 = vector.shape_cast %27 : vector<1x32x384xbf16> to vector<32x384xbf16>
    %c0_31 = arith.constant 0 : index
    %c384 = arith.constant 384 : index
    %29 = vector.load %arg4[%c0_31, %c384] : memref<288x768xbf16, #tpu.memory_space<vmem>>, vector<32x384xbf16>
    tpu.vector_store %arg4[%c0_31, %c384], %28 {strides = array<i32>} : memref<288x768xbf16, #tpu.memory_space<vmem>>, vector<32x384xbf16>,
    %c1_32 = arith.constant 1 : index
    %c0_33 = arith.constant 0 : index
    %c1_34 = arith.constant 1 : index
    %30 = vector.load %arg0[%c1_32, %c0_33, %c1_34] : memref<2x32x456xbf16, #tpu.memory_space<vmem>>, vector<1x32x384xbf16>
    %31 = vector.shape_cast %30 : vector<1x32x384xbf16> to vector<32x384xbf16>
    %c32_35 = arith.constant 32 : index
    %c384_36 = arith.constant 384 : index
    %32 = vector.load %arg4[%c32_35, %c384_36] : memref<288x768xbf16, #tpu.memory_space<vmem>>, vector<32x384xbf16>
    tpu.vector_store %arg4[%c32_35, %c384_36], %31 {strides = array<i32>} : memref<288x768xbf16, #tpu.memory_space<vmem>>, vector<32x384xbf16>,
    %c1_37 = arith.constant 1 : index
    %c0_38 = arith.constant 0 : index
    %c2_39 = arith.constant 2 : index
    %33 = vector.load %arg0[%c1_37, %c0_38, %c2_39] : memref<2x32x456xbf16, #tpu.memory_space<vmem>>, vector<1x32x384xbf16>
    %34 = vector.shape_cast %33 : vector<1x32x384xbf16> to vector<32x384xbf16>
    %c64_40 = arith.constant 64 : index
    %c384_41 = arith.constant 384 : index
    %35 = vector.load %arg4[%c64_40, %c384_41] : memref<288x768xbf16, #tpu.memory_space<vmem>>, vector<32x384xbf16>
    tpu.vector_store %arg4[%c64_40, %c384_41], %34 {strides = array<i32>} : memref<288x768xbf16, #tpu.memory_space<vmem>>, vector<32x384xbf16>,
    %c1_42 = arith.constant 1 : index
    %c0_43 = arith.constant 0 : index
    %c24_44 = arith.constant 24 : index
    %36 = vector.load %arg0[%c1_42, %c0_43, %c24_44] : memref<2x32x456xbf16, #tpu.memory_space<vmem>>, vector<1x32x384xbf16>
    %37 = vector.shape_cast %36 : vector<1x32x384xbf16> to vector<32x384xbf16>
    %c96_45 = arith.constant 96 : index
    %c384_46 = arith.constant 384 : index
    %38 = vector.load %arg4[%c96_45, %c384_46] : memref<288x768xbf16, #tpu.memory_space<vmem>>, vector<32x384xbf16>
    tpu.vector_store %arg4[%c96_45, %c384_46], %37 {strides = array<i32>} : memref<288x768xbf16, #tpu.memory_space<vmem>>, vector<32x384xbf16>,
    %c1_47 = arith.constant 1 : index
    %c0_48 = arith.constant 0 : index
    %c25_49 = arith.constant 25 : index
    %39 = vector.load %arg0[%c1_47, %c0_48, %c25_49] : memref<2x32x456xbf16, #tpu.memory_space<vmem>>, vector<1x32x384xbf16>
    %40 = vector.shape_cast %39 : vector<1x32x384xbf16> to vector<32x384xbf16>
    %c128_50 = arith.constant 128 : index
    %c384_51 = arith.constant 384 : index
    %41 = vector.load %arg4[%c128_50, %c384_51] : memref<288x768xbf16, #tpu.memory_space<vmem>>, vector<32x384xbf16>
    tpu.vector_store %arg4[%c128_50, %c384_51], %40 {strides = array<i32>} : memref<288x768xbf16, #tpu.memory_space<vmem>>, vector<32x384xbf16>,
    %c1_52 = arith.constant 1 : index
    %c0_53 = arith.constant 0 : index
    %c26_54 = arith.constant 26 : index
    %42 = vector.load %arg0[%c1_52, %c0_53, %c26_54] : memref<2x32x456xbf16, #tpu.memory_space<vmem>>, vector<1x32x384xbf16>
    %43 = vector.shape_cast %42 : vector<1x32x384xbf16> to vector<32x384xbf16>
    %c160_55 = arith.constant 160 : index
    %c384_56 = arith.constant 384 : index
    %44 = vector.load %arg4[%c160_55, %c384_56] : memref<288x768xbf16, #tpu.memory_space<vmem>>, vector<32x384xbf16>
    tpu.vector_store %arg4[%c160_55, %c384_56], %43 {strides = array<i32>} : memref<288x768xbf16, #tpu.memory_space<vmem>>, vector<32x384xbf16>,
    %c1_57 = arith.constant 1 : index
    %c0_58 = arith.constant 0 : index
    %c48_59 = arith.constant 48 : index
    %45 = vector.load %arg0[%c1_57, %c0_58, %c48_59] : memref<2x32x456xbf16, #tpu.memory_space<vmem>>, vector<1x32x384xbf16>
    %46 = vector.shape_cast %45 : vector<1x32x384xbf16> to vector<32x384xbf16>
    %c192_60 = arith.constant 192 : index
    %c384_61 = arith.constant 384 : index
    %47 = vector.load %arg4[%c192_60, %c384_61] : memref<288x768xbf16, #tpu.memory_space<vmem>>, vector<32x384xbf16>
    tpu.vector_store %arg4[%c192_60, %c384_61], %46 {strides = array<i32>} : memref<288x768xbf16, #tpu.memory_space<vmem>>, vector<32x384xbf16>,
    %c1_62 = arith.constant 1 : index
    %c0_63 = arith.constant 0 : index
    %c49_64 = arith.constant 49 : index
    %48 = vector.load %arg0[%c1_62, %c0_63, %c49_64] : memref<2x32x456xbf16, #tpu.memory_space<vmem>>, vector<1x32x384xbf16>
    %49 = vector.shape_cast %48 : vector<1x32x384xbf16> to vector<32x384xbf16>
    %c224_65 = arith.constant 224 : index
    %c384_66 = arith.constant 384 : index
    %50 = vector.load %arg4[%c224_65, %c384_66] : memref<288x768xbf16, #tpu.memory_space<vmem>>, vector<32x384xbf16>
    tpu.vector_store %arg4[%c224_65, %c384_66], %49 {strides = array<i32>} : memref<288x768xbf16, #tpu.memory_space<vmem>>, vector<32x384xbf16>,
    %c1_67 = arith.constant 1 : index
    %c0_68 = arith.constant 0 : index
    %c50_69 = arith.constant 50 : index
    %51 = vector.load %arg0[%c1_67, %c0_68, %c50_69] : memref<2x32x456xbf16, #tpu.memory_space<vmem>>, vector<1x32x384xbf16>
    %52 = vector.shape_cast %51 : vector<1x32x384xbf16> to vector<32x384xbf16>
    %c256_70 = arith.constant 256 : index
    %c384_71 = arith.constant 384 : index
    %53 = vector.load %arg4[%c256_70, %c384_71] : memref<288x768xbf16, #tpu.memory_space<vmem>>, vector<32x384xbf16>
    tpu.vector_store %arg4[%c256_70, %c384_71], %52 {strides = array<i32>} : memref<288x768xbf16, #tpu.memory_space<vmem>>, vector<32x384xbf16>,
    %c0_72 = arith.constant 0 : index
    %c0_73 = arith.constant 0 : index
    %54 = vector.load %arg1[%c0_72, %c0_73] : memref<16x288xbf16, #tpu.memory_space<vmem>>, vector<16x288xbf16>
    %c0_74 = arith.constant 0 : index
    %c0_75 = arith.constant 0 : index
    %55 = vector.load %arg4[%c0_74, %c0_75] : memref<288x768xbf16, #tpu.memory_space<vmem>>, vector<288x768xbf16>
    %cst = arith.constant dense<0.000000e+00> : vector<16x768xf32>
    %56 = tpu.matmul %54, %55, %cst {dimension_numbers = #tpu.dot_dimension_numbers<[1], [0], [0], [1], [0, 0, 1, 1], [], []>} : vector<16x288xbf16>, vector<288x768xbf16>, vector<16x768xf32> -> vector<16x768xf32>
    %c0_76 = arith.constant 0 : index
    %c0_77 = arith.constant 0 : index
    %57 = vector.load %arg2[%c0_76, %c0_77] : memref<16x1xf32, #tpu.memory_space<vmem>>, vector<16x1xf32>
    %58 = vector.broadcast %57 : vector<16x1xf32> to vector<16x768xf32>
    %59 = arith.addf %56, %58 : vector<16x768xf32>
    %60 = math.tanh %59 : vector<16x768xf32>
    %61 = vector.extract_strided_slice %60 {offsets = [0, 0], sizes = [16, 384], strides = [1, 1]} : vector<16x768xf32> to vector<16x384xf32>
    %c0_78 = arith.constant 0 : index
    %c0_79 = arith.constant 0 : index
    %c0_80 = arith.constant 0 : index
    %62 = vector.load %arg3[%c0_78, %c0_79, %c0_80] : memref<2x16x384xf32, #tpu.memory_space<vmem>>, vector<1x16x384xf32>
    %63 = vector.shape_cast %62 : vector<1x16x384xf32> to vector<16x384xf32>
    %64 = vector.shape_cast %61 : vector<16x384xf32> to vector<1x16x384xf32>
    tpu.vector_store %arg3[%c0_78, %c0_79, %c0_80], %64 {strides = array<i32>} : memref<2x16x384xf32, #tpu.memory_space<vmem>>, vector<1x16x384xf32>,
    %65 = vector.extract_strided_slice %60 {offsets = [0, 384], sizes = [16, 384], strides = [1, 1]} : vector<16x768xf32> to vector<16x384xf32>
    %c1_81 = arith.constant 1 : index
    %c0_82 = arith.constant 0 : index
    %c0_83 = arith.constant 0 : index
    %66 = vector.load %arg3[%c1_81, %c0_82, %c0_83] : memref<2x16x384xf32, #tpu.memory_space<vmem>>, vector<1x16x384xf32>
    %67 = vector.shape_cast %66 : vector<1x16x384xf32> to vector<16x384xf32>
    %68 = vector.shape_cast %65 : vector<16x384xf32> to vector<1x16x384xf32>
    tpu.vector_store %arg3[%c1_81, %c0_82, %c0_83], %68 {strides = array<i32>} : memref<2x16x384xf32, #tpu.memory_space<vmem>>, vector<1x16x384xf32>,
    return
  }
}

</mosaic_0001>

<bundles_post_ra>
// kernel: cd_encoder_forward.1
= control target key start
LH: loop header
LB: loop body
LE: loop exit
PB: predicated region body
PF: predicated region fallthrough
CT: control target
= control target key end

     0   :  { %s2045_s16 = smov 127   ;;  %s2046_s25 = smov 126   ;;  %v2051_v6 = vmov 0   ;;  %vm117_vm0 = vcmask 1039360   ;;  %vm192_vm1 = vcmask 1031168   ;;  %vm267_vm2 = vcmask 850944   ;;  %s2664_s0 = inlined_call_operand.vmem [shape: bf16[2,32,456], index: 0, kind: input, shape index: {}]   ;;  %s2665_s1 = inlined_call_operand.vmem [shape: bf16[16,288], index: 1, kind: input, shape index: {}]   ;;  %s2666_s2 = inlined_call_operand.vmem [shape: f32[16,1], index: 2, kind: input, shape index: {}]   ;;  %s2667_s3 = inlined_call_operand.vmem [shape: f32[2,16,384], index: 3, kind: output, shape index: {}]  }
   0x1   :  { %v2077_v0 = vld [vmem:[%s2664_s0 + $0x4] ss:$16 sps:$4 sm:$0xff]   ;;  %v2082_v1 = vld [vmem:[%s2664_s0] ss:$16 sps:$4 sm:$0xff]   ;;  %v2089_v2 = vld [vmem:[%s2664_s0 + $0x8] ss:$16 sps:$4 sm:$0xff]   ;;  %1518 = vmatprep.mubr.bf16.mxu0 %v2051_v6  ;;  %1987 = vset.pattern.permute.xlu0 %v2051_v6 }
   0x2   :  { %103 = vrot.lane.b32.xlu0 %v2077_v0, %s2045_s16  ;;  %1443 = vmatprep.subr.bf16.mxu1 %v2077_v0  ;;  %v2097_v3 = vld [vmem:[%s2664_s0 + $0x24] ss:$16 sps:$4 sm:$0xff]   ;;  %v2103_v4 = vld [vmem:[%s2664_s0 + $0x20] ss:$16 sps:$4 sm:$0xff]   ;;  %v2111_v5 = vld [vmem:[%s2664_s0 + $0x28] ss:$16 sps:$4 sm:$0xff]  }
   0x3   :  { %101 = vrot.lane.b32.xlu1 %v2082_v1, %s2045_s16  ;;  %1444 = vmatpush1.bf16.msra.mxu1 %v2082_v1  ;;  %s2047_s26 = smov 104   ;;  %s2048_s27 = smov 103   ;;  %v2184_v7 = vld [vmem:[%s2664_s0 + $0x40] ss:$16 sps:$4 sm:$0xff]   ;;  %v2191_v8 = vld [vmem:[%s2664_s0 + $0x44] ss:$16 sps:$4 sm:$0xff]  }
   0x4   :  { %1445 = vmatprep.subr.bf16.mxu1 %v2097_v3  ;;  %s2049_s28 = smov 78   ;;  %s2050_s29 = smov 102   ;;  %1988 = vset.pattern.permute.xlu1 %v2051_v6  ;;  %v2196_v9 = vld [vmem:[%s2664_s0 + $0xc] ss:$16 sps:$4 sm:$0xff]   ;;  %v2211_v10 = vld [vmem:[%s2664_s0 + $0x60] ss:$16 sps:$4 sm:$0xff]  }
   0x5   :  { %s2052_s9 = smov 80   ;;  %v2218_v11 = vld [vmem:[%s2664_s0 + $0x64] ss:$16 sps:$4 sm:$0xff]   ;;  %v2223_v12 = vld [vmem:[%s2664_s0 + $0x2c] ss:$16 sps:$4 sm:$0xff]   ;;  %s2053_s17 = smov 79  }
   0x6   :  { %105 = vrot.lane.b32.xlu0 %v2089_v2, %s2045_s16  ;;  %v2250_v13 = vld [vmem:[%s2664_s0 + $0x48] ss:$16 sps:$4 sm:$0xff]   ;;  %v2257_v14 = vld [vmem:[%s2664_s0 + $0x4c] ss:$16 sps:$4 sm:$0xff]   ;;  %v2262_v15 = vld [vmem:[%s2665_s1 + $0x4] ss:$12 sps:$4 sm:$0xff]  }
   0x7   :  { %111 = vrot.lane.b32.xlu1 %v2097_v3, %s2045_s16  ;;  %1446 = vmatpush1.bf16.msra.mxu1 %v2103_v4  ;;  %v2272_v16 = vld [vmem:[%s2664_s0 + $0x68] ss:$16 sps:$4 sm:$0xff]   ;;  %v2279_v17 = vld [vmem:[%s2664_s0 + $0x6c] ss:$16 sps:$4 sm:$0xff]   ;;  %vm342_vm3 = vcmask 842752   ;;  %vm642_vm4 = vcmask 637952  }
   0x8   :  { %1475 = vmatprep.mubr.bf16.mxu1 %v2262_v15  ;;  %vm417_vm5 = vcmask 834560   ;;  %vm1439_vm6 = vcmask 261120   ;;  %vm492_vm7 = vcmask 654336   ;;  %vm567_vm8 = vcmask 646144  }
   0xa   :  { %113 = vrot.lane.b32.xlu0 %v2111_v5, %s2045_s16 }
   0xb   :  { %109 = vrot.lane.b32.xlu1 %v2103_v4, %s2045_s16 }
   0xe   :  { %178 = vrot.lane.b32.xlu0 %v2077_v0, %s2046_s25 }
   0xf   :  { %180 = vrot.lane.b32.xlu1 %v2089_v2, %s2046_s25 }
  0x12   :  { %176 = vrot.lane.b32.xlu0 %v2082_v1, %s2046_s25 }
  0x13   :  { %186 = vrot.lane.b32.xlu1 %v2097_v3, %s2046_s25 }
  0x16   :  { %188 = vrot.lane.b32.xlu0 %v2111_v5, %s2046_s25 }
  0x17   :  { %184 = vrot.lane.b32.xlu1 %v2103_v4, %s2046_s25 }
  0x1a   :  { %253 = vrot.lane.b32.xlu0 %v2077_v0, %s2047_s26 }
  0x1b   :  { %255 = vrot.lane.b32.xlu1 %v2089_v2, %s2047_s26 }
  0x1e   :  { %251 = vrot.lane.b32.xlu0 %v2082_v1, %s2047_s26 }
  0x1f   :  { %261 = vrot.lane.b32.xlu1 %v2097_v3, %s2047_s26 }
  0x22   :  { %263 = vrot.lane.b32.xlu0 %v2111_v5, %s2047_s26 }
  0x23   :  { %259 = vrot.lane.b32.xlu1 %v2103_v4, %s2047_s26 }
  0x26   :  { %328 = vrot.lane.b32.xlu0 %v2077_v0, %s2048_s27 }
  0x27   :  { %330 = vrot.lane.b32.xlu1 %v2089_v2, %s2048_s27 }
  0x2a   :  { %326 = vrot.lane.b32.xlu0 %v2082_v1, %s2048_s27 }
  0x2b   :  { %336 = vrot.lane.b32.xlu1 %v2097_v3, %s2048_s27 }
  0x2e   :  { %338 = vrot.lane.b32.xlu0 %v2111_v5, %s2048_s27 }
  0x2f   :  { %334 = vrot.lane.b32.xlu1 %v2103_v4, %s2048_s27 }
  0x32   :  { %628 = vrot.lane.b32.xlu0 %v2077_v0, %s2049_s28 }
  0x33   :  { %630 = vrot.lane.b32.xlu1 %v2089_v2, %s2049_s28 }
  0x36   :  { %626 = vrot.lane.b32.xlu0 %v2082_v1, %s2049_s28 }
  0x37   :  { %403 = vrot.lane.b32.xlu1 %v2077_v0, %s2050_s29 }
  0x3a   :  { %405 = vrot.lane.b32.xlu0 %v2089_v2, %s2050_s29 }
  0x3b   :  { %401 = vrot.lane.b32.xlu1 %v2082_v1, %s2050_s29 }
  0x3e   :  { %636 = vrot.lane.b32.xlu0 %v2097_v3, %s2049_s28 }
  0x3f   :  { %638 = vrot.lane.b32.xlu1 %v2111_v5, %s2049_s28 }
  0x42   :  { %634 = vrot.lane.b32.xlu0 %v2103_v4, %s2049_s28 }
  0x43   :  { %411 = vrot.lane.b32.xlu1 %v2097_v3, %s2050_s29 }
  0x46   :  { %413 = vrot.lane.b32.xlu0 %v2111_v5, %s2050_s29 }
  0x47   :  { %409 = vrot.lane.b32.xlu1 %v2103_v4, %s2050_s29 }
  0x4a   :  { %1266 = vrot.lane.b32.xlu0 %v2184_v7, %s2049_s28 }
  0x4b   :  { %1268 = vrot.lane.b32.xlu1 %v2191_v8, %s2049_s28 }
  0x4e   :  { %632 = vrot.lane.b32.xlu0 %v2196_v9, %s2049_s28 }
  0x4f   :  { %478 = vrot.lane.b32.xlu1 %v2077_v0, %s2052_s9 }
  0x52   :  { %480 = vrot.lane.b32.xlu0 %v2089_v2, %s2052_s9 }
  0x53   :  { %476 = vrot.lane.b32.xlu1 %v2082_v1, %s2052_s9 }
  0x56   :  { %1274 = vrot.lane.b32.xlu0 %v2211_v10, %s2049_s28 }
  0x57   :  { %1276 = vrot.lane.b32.xlu1 %v2218_v11, %s2049_s28 }
  0x5a   :  { %640 = vrot.lane.b32.xlu0 %v2223_v12, %s2049_s28 }
  0x5b   :  { %486 = vrot.lane.b32.xlu1 %v2097_v3, %s2052_s9 }
  0x5e   :  { %488 = vrot.lane.b32.xlu0 %v2111_v5, %s2052_s9 }
  0x5f   :  { %484 = vrot.lane.b32.xlu1 %v2103_v4, %s2052_s9 }
  0x62   :  { %553 = vrot.lane.b32.xlu0 %v2077_v0, %s2053_s17 }
  0x63   :  { %555 = vrot.lane.b32.xlu1 %v2089_v2, %s2053_s17 }
  0x66   :  { %551 = vrot.lane.b32.xlu0 %v2082_v1, %s2053_s17 }
  0x67   :  { %561 = vrot.lane.b32.xlu1 %v2097_v3, %s2053_s17 }
  0x6a   :  { %563 = vrot.lane.b32.xlu0 %v2111_v5, %s2053_s17 }
  0x6b   :  { %559 = vrot.lane.b32.xlu1 %v2103_v4, %s2053_s17 }
  0x6e   :  { %752 = vrot.lane.b32.xlu0 %v2250_v13, %s2045_s16 }
  0x6f   :  { %754 = vrot.lane.b32.xlu1 %v2257_v14, %s2045_s16 }
  0x72   :  { %750 = vrot.lane.b32.xlu0 %v2191_v8, %s2045_s16 }
  0x73   :  { %760 = vrot.lane.b32.xlu1 %v2272_v16, %s2045_s16 }
  0x74   :  { %v104_v18 = vpop.permute.xlu0 %103 }
  0x75   :  { %v102_v19 = vpop.permute.xlu1 %101 }
  0x76   :  { %762 = vrot.lane.b32.xlu0 %v2279_v17, %s2045_s16  ;;  %v118_v23 = vsel %vm117_vm0, %v102_v19, %v104_v18 }
  0x77   :  { %758 = vrot.lane.b32.xlu1 %v2218_v11, %s2045_s16 }
  0x78   :  { %v2287_v20 = vpop.permute.xlu0 %105 }
  0x79   :  { %v112_v21 = vpop.permute.xlu1 %111  ;;  %v119_v22 = vsel %vm117_vm0, %v104_v18, %v2287_v20 }
  0x7a   :  { %826 = vrot.lane.b32.xlu0 %v2250_v13, %s2046_s25  ;;  %1447 = vmatprep.subr.bf16.mxu1 %v119_v22 }
  0x7b   :  { %828 = vrot.lane.b32.xlu1 %v2257_v14, %s2046_s25  ;;  %1448 = vmatpush1.bf16.msra.mxu1 %v118_v23  ;;  %v2399_v23 = vld [vmem:[%s2665_s1 + $0x8] ss:$12 sps:$4 sm:$0xff]  }
  0x7c   :  { %v2296_v24 = vpop.permute.xlu0 %113 }
  0x7d   :  { %v110_v25 = vpop.permute.xlu1 %109  ;;  %v122_v26 = vsel %vm117_vm0, %v112_v21, %v2296_v24 }
  0x7e   :  { %824 = vrot.lane.b32.xlu0 %v2191_v8, %s2046_s25  ;;  %1449 = vmatprep.subr.bf16.mxu1 %v122_v26  ;;  %v121_v27 = vsel %vm117_vm0, %v110_v25, %v112_v21 }
  0x7f   :  { %748 = vrot.lane.b32.xlu1 %v2184_v7, %s2045_s16  ;;  %1450 = vmatpush1.bf16.msra.mxu1 %v121_v27 }
  0x80   :  { %v179_v28 = vpop.permute.xlu0 %178 }
  0x81   :  { %v2305_v29 = vpop.permute.xlu1 %180 }
  0x82   :  { %107 = vrot.lane.b32.xlu0 %v2196_v9, %s2045_s16  ;;  %v194_v30 = vsel %vm192_vm1, %v179_v28, %v2305_v29 }
  0x83   :  { %834 = vrot.lane.b32.xlu1 %v2272_v16, %s2046_s25  ;;  %1451 = vmatprep.subr.bf16.mxu1 %v194_v30 }
  0x84   :  { %v177_v31 = vpop.permute.xlu0 %176 }
  0x85   :  { %v187_v32 = vpop.permute.xlu1 %186  ;;  %v193_v33 = vsel %vm192_vm1, %v177_v31, %v179_v28 }
  0x86   :  { %836 = vrot.lane.b32.xlu0 %v2279_v17, %s2046_s25  ;;  %1452 = vmatpush1.bf16.msra.mxu1 %v193_v33 }
  0x87   :  { %832 = vrot.lane.b32.xlu1 %v2218_v11, %s2046_s25 }
  0x88   :  { %v2318_v34 = vpop.permute.xlu0 %188 }
  0x89   :  { %v185_v35 = vpop.permute.xlu1 %184  ;;  %v197_v36 = vsel %vm192_vm1, %v187_v32, %v2318_v34 }
  0x8a   :  { %756 = vrot.lane.b32.xlu0 %v2211_v10, %s2045_s16  ;;  %1453 = vmatprep.subr.bf16.mxu1 %v197_v36  ;;  %v196_v37 = vsel %vm192_vm1, %v185_v35, %v187_v32 }
  0x8b   :  { %115 = vrot.lane.b32.xlu1 %v2223_v12, %s2045_s16  ;;  %1454 = vmatpush1.bf16.msra.mxu1 %v196_v37 }
  0x8c   :  { %v254_v38 = vpop.permute.xlu0 %253 }
  0x8d   :  { %v2327_v39 = vpop.permute.xlu1 %255 }
  0x8e   :  { %900 = vrot.lane.b32.xlu0 %v2250_v13, %s2047_s26  ;;  %v269_v40 = vsel %vm267_vm2, %v254_v38, %v2327_v39 }
  0x8f   :  { %902 = vrot.lane.b32.xlu1 %v2257_v14, %s2047_s26  ;;  %1455 = vmatprep.subr.bf16.mxu1 %v269_v40 }
  0x90   :  { %v252_v41 = vpop.permute.xlu0 %251 }
  0x91   :  { %v262_v42 = vpop.permute.xlu1 %261  ;;  %v268_v43 = vsel %vm267_vm2, %v252_v41, %v254_v38 }
  0x92   :  { %898 = vrot.lane.b32.xlu0 %v2191_v8, %s2047_s26  ;;  %1456 = vmatpush1.bf16.msra.mxu1 %v268_v43 }
  0x93   :  { %822 = vrot.lane.b32.xlu1 %v2184_v7, %s2046_s25 }
  0x94   :  { %v2340_v44 = vpop.permute.xlu0 %263 }
  0x95   :  { %v260_v45 = vpop.permute.xlu1 %259  ;;  %v272_v46 = vsel %vm267_vm2, %v262_v42, %v2340_v44 }
  0x96   :  { %182 = vrot.lane.b32.xlu0 %v2196_v9, %s2046_s25  ;;  %1457 = vmatprep.subr.bf16.mxu1 %v272_v46  ;;  %v271_v47 = vsel %vm267_vm2, %v260_v45, %v262_v42  ;;  %v2014_v46 = vld [vmem:[%s2664_s0 + $0x48] ss:$16 sps:$4 sm:$0xff]  }
  0x97   :  { %908 = vrot.lane.b32.xlu1 %v2272_v16, %s2047_s26  ;;  %1458 = vmatpush1.bf16.msra.mxu1 %v271_v47 }
  0x98   :  { %v329_v48 = vpop.permute.xlu0 %328 }
  0x99   :  { %v2349_v49 = vpop.permute.xlu1 %330 }
  0x9a   :  { %910 = vrot.lane.b32.xlu0 %v2279_v17, %s2047_s26  ;;  %v344_v50 = vsel %vm342_vm3, %v329_v48, %v2349_v49 }
  0x9b   :  { %906 = vrot.lane.b32.xlu1 %v2218_v11, %s2047_s26  ;;  %1459 = vmatprep.subr.bf16.mxu1 %v344_v50 }
  0x9c   :  { %v327_v51 = vpop.permute.xlu0 %326 }
  0x9d   :  { %v337_v52 = vpop.permute.xlu1 %336  ;;  %v343_v53 = vsel %vm342_vm3, %v327_v51, %v329_v48 }
  0x9e   :  { %830 = vrot.lane.b32.xlu0 %v2211_v10, %s2046_s25  ;;  %1460 = vmatpush1.bf16.msra.mxu1 %v343_v53 }
  0x9f   :  { %190 = vrot.lane.b32.xlu1 %v2223_v12, %s2046_s25 }
  0xa0   :  { %v2362_v54 = vpop.permute.xlu0 %338 }
  0xa1   :  { %v335_v55 = vpop.permute.xlu1 %334  ;;  %v347_v56 = vsel %vm342_vm3, %v337_v52, %v2362_v54 }
  0xa2   :  { %974 = vrot.lane.b32.xlu0 %v2250_v13, %s2048_s27  ;;  %1461 = vmatprep.subr.bf16.mxu1 %v347_v56  ;;  %v346_v57 = vsel %vm342_vm3, %v335_v55, %v337_v52  ;;  %v2015_v55 = vld [vmem:[%s2664_s0 + $0x68] ss:$16 sps:$4 sm:$0xff]  }
  0xa3   :  { %976 = vrot.lane.b32.xlu1 %v2257_v14, %s2048_s27  ;;  %1462 = vmatpush1.bf16.msra.mxu1 %v346_v57 }
  0xa4   :  { %v629_v58 = vpop.permute.xlu0 %628 }
  0xa5   :  { %v631_v59 = vpop.permute.xlu1 %630 }
  0xa6   :  { %972 = vrot.lane.b32.xlu0 %v2191_v8, %s2048_s27  ;;  %v644_v60 = vsel %vm642_vm4, %v629_v58, %v631_v59 }
  0xa7   :  { %896 = vrot.lane.b32.xlu1 %v2184_v7, %s2047_s26  ;;  %1486 = vmatprep.subr.bf16.mxu0 %v644_v60 }
  0xa8   :  { %v627_v61 = vpop.permute.xlu0 %626 }
  0xa9   :  { %v404_v62 = vpop.permute.xlu1 %403  ;;  %v643_v63 = vsel %vm642_vm4, %v627_v61, %v629_v58 }
  0xaa   :  { %257 = vrot.lane.b32.xlu0 %v2196_v9, %s2047_s26  ;;  %1487 = vmatpush1.bf16.msra.mxu0 %v643_v63 }
  0xab   :  { %982 = vrot.lane.b32.xlu1 %v2272_v16, %s2048_s27 }
  0xac   :  { %v2381_v0 = vpop.permute.xlu0 %405 }
  0xad   :  { %v402_v1 = vpop.permute.xlu1 %401  ;;  %v419_v2 = vsel %vm417_vm5, %v404_v62, %v2381_v0 }
  0xae   :  { %984 = vrot.lane.b32.xlu0 %v2279_v17, %s2048_s27  ;;  %1463 = vmatprep.subr.bf16.mxu1 %v419_v2  ;;  %v418_v3 = vsel %vm417_vm5, %v402_v1, %v404_v62 }
  0xaf   :  { %980 = vrot.lane.b32.xlu1 %v2218_v11, %s2048_s27  ;;  %1464 = vmatpush1.bf16.msra.mxu1 %v418_v3 }
  0xb0   :  { %v637_v4 = vpop.permute.xlu0 %636 }
  0xb1   :  { %v639_v5 = vpop.permute.xlu1 %638 }
  0xb2   :  { %904 = vrot.lane.b32.xlu0 %v2211_v10, %s2047_s26  ;;  %v647_v18 = vsel %vm642_vm4, %v637_v4, %v639_v5 }
  0xb3   :  { %265 = vrot.lane.b32.xlu1 %v2223_v12, %s2047_s26  ;;  %1488 = vmatprep.subr.bf16.mxu0 %v647_v18  ;;  %v2019_v18 = vld [vmem:[%s2664_s0 + $0x8] ss:$16 sps:$4 sm:$0xff]  }
  0xb4   :  { %v635_v19 = vpop.permute.xlu0 %634 }
  0xb5   :  { %v412_v21 = vpop.permute.xlu1 %411  ;;  %v646_v22 = vsel %vm642_vm4, %v635_v19, %v637_v4  ;;  %v2495_v4 = vld [vmem:[%s2665_s1] ss:$12 sps:$4 sm:$0xff]  }
  0xb6   :  { %1048 = vrot.lane.b32.xlu0 %v2250_v13, %s2050_s29  ;;  %1489 = vmatpush1.bf16.msra.mxu0 %v646_v22 }
  0xb7   :  { %1050 = vrot.lane.b32.xlu1 %v2257_v14, %s2050_s29 }
  0xb8   :  { %v2405_v25 = vpop.permute.xlu0 %413 }
  0xb9   :  { %v410_v26 = vpop.permute.xlu1 %409  ;;  %v422_v27 = vsel %vm417_vm5, %v412_v21, %v2405_v25  ;;  %1945 = vmatmul.mubr.msk.bf16.vlgmr.msra.gmra.mrb[0].mxu0 %vm1439_vm6, %v2399_v23 }
  0xba   :  { %1046 = vrot.lane.b32.xlu0 %v2191_v8, %s2050_s29  ;;  %1465 = vmatprep.subr.bf16.mxu1 %v422_v27  ;;  %v421_v28 = vsel %vm417_vm5, %v410_v26, %v412_v21  ;;  %v2020_v26 = vld [vmem:[%s2664_s0 + $0x28] ss:$16 sps:$4 sm:$0xff]  }
  0xbb   :  { %970 = vrot.lane.b32.xlu1 %v2184_v7, %s2048_s27  ;;  %1466 = vmatpush1.bf16.msra.mxu1 %v421_v28 }
  0xbc   :  { %v1267_v30 = vpop.permute.xlu0 %1266  ;;  %1604 = vmatprep.mubr.bf16.mxu0 %v2051_v6 }
  0xbd   :  { %v2417_v31 = vpop.permute.xlu1 %1268 }
  0xbe   :  { %332 = vrot.lane.b32.xlu0 %v2196_v9, %s2048_s27  ;;  %v1282_v32 = vsel %vm642_vm4, %v1267_v30, %v2417_v31 }
  0xbf   :  { %1056 = vrot.lane.b32.xlu1 %v2272_v16, %s2050_s29  ;;  %1572 = vmatprep.subr.bf16.mxu0 %v1282_v32 }
  0xc0   :  { %v633_v33 = vpop.permute.xlu0 %632 }
  0xc1   :  { %v645_v35 = vsel %vm642_vm4, %v631_v59, %v633_v33  ;;  %v479_v36 = vpop.permute.xlu1 %478 }
  0xc2   :  { %1058 = vrot.lane.b32.xlu0 %v2279_v17, %s2050_s29  ;;  %1573 = vmatpush1.bf16.msra.mxu0 %v645_v35 }
  0xc3   :  { %1054 = vrot.lane.b32.xlu1 %v2218_v11, %s2050_s29 }
  0xc4   :  { %v2430_v37 = vpop.permute.xlu0 %480 }
  0xc5   :  { %v477_v38 = vpop.permute.xlu1 %476  ;;  %v494_v40 = vsel %vm492_vm7, %v479_v36, %v2430_v37 }
  0xc6   :  { %978 = vrot.lane.b32.xlu0 %v2211_v10, %s2048_s27  ;;  %1467 = vmatprep.subr.bf16.mxu1 %v494_v40  ;;  %v493_v41 = vsel %vm492_vm7, %v477_v38, %v479_v36 }
  0xc7   :  { %340 = vrot.lane.b32.xlu1 %v2223_v12, %s2048_s27  ;;  %1468 = vmatpush1.bf16.msra.mxu1 %v493_v41 }
  0xc8   :  { %v1275_v42 = vpop.permute.xlu0 %1274 }
  0xc9   :  { %v2439_v43 = vpop.permute.xlu1 %1276 }
  0xca   :  { %1122 = vrot.lane.b32.xlu0 %v2250_v13, %s2052_s9  ;;  %v1285_v45 = vsel %vm642_vm4, %v1275_v42, %v2439_v43 }
  0xcb   :  { %1124 = vrot.lane.b32.xlu1 %v2257_v14, %s2052_s9  ;;  %1574 = vmatprep.subr.bf16.mxu0 %v1285_v45 }
  0xcc   :  { %v641_v47 = vpop.permute.xlu0 %640 }
  0xcd   :  { %v648_v48 = vsel %vm642_vm4, %v639_v5, %v641_v47  ;;  %v487_v50 = vpop.permute.xlu1 %486 }
  0xce   :  { %1120 = vrot.lane.b32.xlu0 %v2191_v8, %s2052_s9  ;;  %1575 = vmatpush1.bf16.msra.mxu0 %v648_v48 }
  0xcf   :  { %1044 = vrot.lane.b32.xlu1 %v2184_v7, %s2050_s29  ;;  %1615 = vmatprep.subr.bf16.mxu0 %v2014_v46 }
  0xd0   :  { %v2455_v51 = vpop.permute.xlu0 %488 }
  0xd1   :  { %v485_v52 = vpop.permute.xlu1 %484  ;;  %v497_v53 = vsel %vm492_vm7, %v487_v50, %v2455_v51  ;;  %1946 = vmatmul.mubr.msk.bf16.vlgmr.msra.gmra.mrb[4].mxu0 %vm1439_vm6, %v2399_v23 }
  0xd2   :  { %407 = vrot.lane.b32.xlu0 %v2196_v9, %s2050_s29  ;;  %1469 = vmatprep.subr.bf16.mxu1 %v497_v53  ;;  %v496_v56 = vsel %vm492_vm7, %v485_v52, %v487_v50  ;;  %v1413_v52 = vld [vmem:[%s2666_s2 + $0x8] sm:$0xff] }
  0xd3   :  { %1130 = vrot.lane.b32.xlu1 %v2272_v16, %s2052_s9  ;;  %1470 = vmatpush1.bf16.msra.mxu1 %v496_v56 }
  0xd4   :  { %v554_v57 = vpop.permute.xlu0 %553  ;;  %1616 = vmatpush1.bf16.msra.mxu0 %v2191_v8  ;;  %1647 = vmatprep.mubr.bf16.mxu0 %v2262_v15 }
  0xd5   :  { %v2471_v58 = vpop.permute.xlu1 %555  ;;  %1617 = vmatprep.subr.bf16.mxu0 %v2015_v55 }
  0xd6   :  { %1132 = vrot.lane.b32.xlu0 %v2279_v17, %s2052_s9  ;;  %v569_v59 = vsel %vm567_vm8, %v554_v57, %v2471_v58 }
  0xd7   :  { %1128 = vrot.lane.b32.xlu1 %v2218_v11, %s2052_s9  ;;  %1471 = vmatprep.subr.bf16.mxu1 %v569_v59 }
  0xd8   :  { %v552_v60 = vpop.permute.xlu0 %551  ;;  %1618 = vmatpush1.bf16.msra.mxu0 %v2218_v11 }
  0xd9   :  { %v562_v61 = vpop.permute.xlu1 %561  ;;  %v568_v62 = vsel %vm567_vm8, %v552_v60, %v554_v57 }
  0xda   :  { %1052 = vrot.lane.b32.xlu0 %v2211_v10, %s2050_s29  ;;  %1472 = vmatpush1.bf16.msra.mxu1 %v568_v62 }
  0xdb   :  { %415 = vrot.lane.b32.xlu1 %v2223_v12, %s2050_s29 }
  0xdc   :  { %v2485_v63 = vpop.permute.xlu0 %563 }
  0xdd   :  { %v560_v1 = vpop.permute.xlu1 %559  ;;  %v572_v2 = vsel %vm567_vm8, %v562_v61, %v2485_v63 }
  0xde   :  { %1196 = vrot.lane.b32.xlu0 %v2250_v13, %s2053_s17  ;;  %1473 = vmatprep.subr.bf16.mxu1 %v572_v2  ;;  %v571_v3 = vsel %vm567_vm8, %v560_v1, %v562_v61 }
  0xdf   :  { %1198 = vrot.lane.b32.xlu1 %v2257_v14, %s2053_s17  ;;  %1474 = vmatpush1.bf16.msra.mxu1 %v571_v3 }
  0xe0   :  { %v753_v5 = vpop.permute.xlu0 %752  ;;  %1529 = vmatprep.subr.bf16.mxu1 %v2184_v7 }
  0xe1   :  { %v755_v19 = vpop.permute.xlu1 %754 }
  0xe2   :  { %1194 = vrot.lane.b32.xlu0 %v2191_v8, %s2053_s17  ;;  %v766_v21 = vsel %vm117_vm0, %v753_v5, %v755_v19  ;;  %1476 = vmatmul.mubr.bf16.vlgmr.msra.gmra.mrb[0].mxu1 %v2495_v4 }
  0xe3   :  { %1118 = vrot.lane.b32.xlu1 %v2184_v7, %s2052_s9  ;;  %1619 = vmatprep.subr.bf16.mxu0 %v766_v21 }
  0xe4   :  { %v751_v22 = vpop.permute.xlu0 %750  ;;  %1530 = vmatpush1.bf16.msra.mxu1 %v2019_v18  ;;  %1561 = vmatprep.mubr.bf16.mxu1 %v2262_v15 }
  0xe5   :  { %v765_v27 = vsel %vm117_vm0, %v751_v22, %v753_v5  ;;  %v761_v28 = vpop.permute.xlu1 %760  ;;  %1531 = vmatprep.subr.bf16.mxu1 %v2211_v10 }
  0xe6   :  { %482 = vrot.lane.b32.xlu0 %v2196_v9, %s2052_s9  ;;  %1620 = vmatpush1.bf16.msra.mxu0 %v765_v27 }
  0xe7   :  { %1204 = vrot.lane.b32.xlu1 %v2272_v16, %s2053_s17 }
  0xe8   :  { %v763_v8 = vpop.permute.xlu0 %762  ;;  %1532 = vmatpush1.bf16.msra.mxu1 %v2020_v26 }
  0xe9   :  { %v759_v30 = vpop.permute.xlu1 %758  ;;  %v769_v32 = vsel %vm117_vm0, %v761_v28, %v763_v8 }
  0xea   :  { %v768_v33 = vsel %vm117_vm0, %v759_v30, %v761_v28  ;;  %1206 = vrot.lane.b32.xlu0 %v2279_v17, %s2053_s17  ;;  %1621 = vmatprep.subr.bf16.mxu0 %v769_v32 }
  0xeb   :  { %1202 = vrot.lane.b32.xlu1 %v2218_v11, %s2053_s17  ;;  %1622 = vmatpush1.bf16.msra.mxu0 %v768_v33 }
  0xec   :  { %v827_v15 = vpop.permute.xlu0 %826 }
  0xed   :  { %v829_v35 = vpop.permute.xlu1 %828 }
  0xee   :  { %1126 = vrot.lane.b32.xlu0 %v2211_v10, %s2052_s9  ;;  %v840_v36 = vsel %vm192_vm1, %v827_v15, %v829_v35 }
  0xef   :  { %490 = vrot.lane.b32.xlu1 %v2223_v12, %s2052_s9  ;;  %1623 = vmatprep.subr.bf16.mxu0 %v840_v36 }
  0xf0   :  { %v825_v38 = vpop.permute.xlu0 %824 }
  0xf1   :  { %v839_v40 = vsel %vm192_vm1, %v825_v38, %v827_v15  ;;  %v749_v41 = vpop.permute.xlu1 %748 }
  0xf2   :  { %1192 = vrot.lane.b32.xlu0 %v2184_v7, %s2053_s17  ;;  %v764_v11 = vsel %vm117_vm0, %v749_v41, %v751_v22  ;;  %1624 = vmatpush1.bf16.msra.mxu0 %v839_v40 }
  0xf3   :  { %557 = vrot.lane.b32.xlu1 %v2196_v9, %s2053_s17  ;;  %1533 = vmatprep.subr.bf16.mxu1 %v764_v11 }
  0xf4   :  { %v108_v42 = vpop.permute.xlu0 %107 }
  0xf5   :  { %v120_v45 = vsel %vm117_vm0, %v2287_v20, %v108_v42  ;;  %v835_v46 = vpop.permute.xlu1 %834 }
  0xf6   :  { %1270 = vrot.lane.b32.xlu0 %v2250_v13, %s2049_s28  ;;  %1534 = vmatpush1.bf16.msra.mxu1 %v120_v45 }
  0xf7   :  { %1272 = vrot.lane.b32.xlu1 %v2257_v14, %s2049_s28 }
  0xf8   :  { %v837_v7 = vpop.permute.xlu0 %836 }
  0xf9   :  { %v833_v47 = vpop.permute.xlu1 %832  ;;  %v843_v48 = vsel %vm192_vm1, %v835_v46, %v837_v7 }
  0xfa   :  { %v842_v50 = vsel %vm192_vm1, %v833_v47, %v835_v46  ;;  %1200 = vrot.lane.b32.xlu0 %v2211_v10, %s2053_s17  ;;  %1625 = vmatprep.subr.bf16.mxu0 %v843_v48  ;;  %v1412_v10 = vld [vmem:[%s2666_s2] sm:$0xff] }
  0xfb   :  { %565 = vrot.lane.b32.xlu1 %v2223_v12, %s2053_s17  ;;  %1626 = vmatpush1.bf16.msra.mxu0 %v842_v50 }
  0xfc   :  { %v757_v9 = vpop.permute.xlu0 %756 }
  0xfd   :  { %v116_v13 = vpop.permute.xlu1 %115  ;;  %v767_v20 = vsel %vm117_vm0, %v757_v9, %v759_v30 }
  0xfe   :  { %v123_v14 = vsel %vm117_vm0, %v2296_v24, %v116_v13  ;;  %1278 = vrot.lane.b32.xlu0 %v2272_v16, %s2049_s28  ;;  %1535 = vmatprep.subr.bf16.mxu1 %v767_v20 }
  0xff   :  { %1280 = vrot.lane.b32.xlu1 %v2279_v17, %s2049_s28  ;;  %1536 = vmatpush1.bf16.msra.mxu1 %v123_v14 }
 0x100   :  { %v901_v12 = vpop.permute.xlu0 %900 }
 0x101   :  { %v903_v53 = vpop.permute.xlu1 %902 }
 0x102   :  { %v914_v24 = vsel %vm267_vm2, %v901_v12, %v903_v53  ;;  %1416 = vperm.xlu0 %1987, %v1412_v10  }
 0x103   :  { %1627 = vmatprep.subr.bf16.mxu0 %v914_v24  ;;  %1421 = vperm.xlu1 %1988, %v1413_v52  }
 0x104   :  { %v899_v16 = vpop.permute.xlu0 %898 }
 0x105   :  { %v913_v55 = vsel %vm267_vm2, %v899_v16, %v901_v12  ;;  %v823_v17 = vpop.permute.xlu1 %822 }
 0x106   :  { %v838_v56 = vsel %vm192_vm1, %v823_v17, %v825_v38  ;;  %1628 = vmatpush1.bf16.msra.mxu0 %v913_v55 }
 0x107   :  { %1537 = vmatprep.subr.bf16.mxu1 %v838_v56 }
 0x108   :  { %v183_v57 = vpop.permute.xlu0 %182 }
 0x109   :  { %v195_v59 = vsel %vm192_vm1, %v2305_v29, %v183_v57  ;;  %v909_v60 = vpop.permute.xlu1 %908 }
 0x10a   :  { %1538 = vmatpush1.bf16.msra.mxu1 %v195_v59 }
 0x10c   :  { %v911_v61 = vpop.permute.xlu0 %910 }
 0x10d   :  { %v907_v62 = vpop.permute.xlu1 %906  ;;  %v917_v1 = vsel %vm267_vm2, %v909_v60, %v911_v61 }
 0x10e   :  { %v916_v2 = vsel %vm267_vm2, %v907_v62, %v909_v60  ;;  %1629 = vmatprep.subr.bf16.mxu0 %v917_v1 }
 0x10f   :  { %1630 = vmatpush1.bf16.msra.mxu0 %v916_v2 }
 0x110   :  { %v831_v3 = vpop.permute.xlu0 %830 }
 0x111   :  { %v191_v5 = vpop.permute.xlu1 %190  ;;  %v841_v18 = vsel %vm192_vm1, %v831_v3, %v833_v47 }
 0x112   :  { %v198_v19 = vsel %vm192_vm1, %v2318_v34, %v191_v5  ;;  %1539 = vmatprep.subr.bf16.mxu1 %v841_v18 }
 0x113   :  { %1540 = vmatpush1.bf16.msra.mxu1 %v198_v19 }
 0x114   :  { %v975_v29 = vpop.permute.xlu0 %974 }
 0x115   :  { %v977_v21 = vpop.permute.xlu1 %976 }
 0x116   :  { %v988_v22 = vsel %vm342_vm3, %v975_v29, %v977_v21 }
 0x117   :  { %1631 = vmatprep.subr.bf16.mxu0 %v988_v22 }
 0x118   :  { %v973_v26 = vpop.permute.xlu0 %972 }
 0x119   :  { %v987_v27 = vsel %vm342_vm3, %v973_v26, %v975_v29  ;;  %v897_v28 = vpop.permute.xlu1 %896 }
 0x11a   :  { %v912_v8 = vsel %vm267_vm2, %v897_v28, %v899_v16  ;;  %1632 = vmatpush1.bf16.msra.mxu0 %v987_v27 }
 0x11b   :  { %1541 = vmatprep.subr.bf16.mxu1 %v912_v8 }
 0x11c   :  { %v258_v30 = vpop.permute.xlu0 %257 }
 0x11d   :  { %v270_v32 = vsel %vm267_vm2, %v2327_v39, %v258_v30  ;;  %v983_v34 = vpop.permute.xlu1 %982 }
 0x11e   :  { %1542 = vmatpush1.bf16.msra.mxu1 %v270_v32 }
 0x120   :  { %v985_v33 = vpop.permute.xlu0 %984 }
 0x121   :  { %v981_v15 = vpop.permute.xlu1 %980  ;;  %v991_v35 = vsel %vm342_vm3, %v983_v34, %v985_v33 }
 0x122   :  { %v990_v36 = vsel %vm342_vm3, %v981_v15, %v983_v34  ;;  %1633 = vmatprep.subr.bf16.mxu0 %v991_v35 }
 0x123   :  { %1634 = vmatpush1.bf16.msra.mxu0 %v990_v36 }
 0x124   :  { %v905_v38 = vpop.permute.xlu0 %904 }
 0x125   :  { %v266_v40 = vpop.permute.xlu1 %265  ;;  %v915_v41 = vsel %vm267_vm2, %v905_v38, %v907_v62 }
 0x126   :  { %v273_v11 = vsel %vm267_vm2, %v2340_v44, %v266_v40  ;;  %1543 = vmatprep.subr.bf16.mxu1 %v915_v41 }
 0x127   :  { %1544 = vmatpush1.bf16.msra.mxu1 %v273_v11 }
 0x128   :  { %v1049_v39 = vpop.permute.xlu0 %1048 }
 0x129   :  { %v1051_v42 = vpop.permute.xlu1 %1050 }
 0x12a   :  { %v1062_v45 = vsel %vm417_vm5, %v1049_v39, %v1051_v42 }
 0x12b   :  { %1635 = vmatprep.subr.bf16.mxu0 %v1062_v45 }
 0x12c   :  { %v1047_v46 = vpop.permute.xlu0 %1046 }
 0x12d   :  { %v1061_v7 = vsel %vm417_vm5, %v1047_v46, %v1049_v39  ;;  %v971_v47 = vpop.permute.xlu1 %970 }
 0x12e   :  { %v986_v48 = vsel %vm342_vm3, %v971_v47, %v973_v26  ;;  %1636 = vmatpush1.bf16.msra.mxu0 %v1061_v7 }
 0x12f   :  { %1545 = vmatprep.subr.bf16.mxu1 %v986_v48 }
 0x130   :  { %v333_v50 = vpop.permute.xlu0 %332 }
 0x131   :  { %v345_v9 = vsel %vm342_vm3, %v2349_v49, %v333_v50  ;;  %v1057_v44 = vpop.permute.xlu1 %1056 }
 0x132   :  { %1546 = vmatpush1.bf16.msra.mxu1 %v345_v9 }
 0x134   :  { %v1059_v13 = vpop.permute.xlu0 %1058 }
 0x135   :  { %v1055_v20 = vpop.permute.xlu1 %1054  ;;  %v1065_v14 = vsel %vm417_vm5, %v1057_v44, %v1059_v13 }
 0x136   :  { %v1064_v10 = vsel %vm417_vm5, %v1055_v20, %v1057_v44  ;;  %1637 = vmatprep.subr.bf16.mxu0 %v1065_v14 }
 0x137   :  { %1638 = vmatpush1.bf16.msra.mxu0 %v1064_v10 }
 0x138   :  { %v979_v12 = vpop.permute.xlu0 %978 }
 0x139   :  { %v341_v52 = vpop.permute.xlu1 %340  ;;  %v989_v53 = vsel %vm342_vm3, %v979_v12, %v981_v15 }
 0x13a   :  { %v348_v24 = vsel %vm342_vm3, %v2362_v54, %v341_v52  ;;  %1547 = vmatprep.subr.bf16.mxu1 %v989_v53 }
 0x13b   :  { %1548 = vmatpush1.bf16.msra.mxu1 %v348_v24 }
 0x13c   :  { %v1123_v49 = vpop.permute.xlu0 %1122 }
 0x13d   :  { %v1125_v16 = vpop.permute.xlu1 %1124 }
 0x13e   :  { %v1136_v55 = vsel %vm492_vm7, %v1123_v49, %v1125_v16 }
 0x13f   :  { %1639 = vmatprep.subr.bf16.mxu0 %v1136_v55 }
 0x140   :  { %v1121_v17 = vpop.permute.xlu0 %1120 }
 0x141   :  { %v1135_v56 = vsel %vm492_vm7, %v1121_v17, %v1123_v49  ;;  %v1045_v57 = vpop.permute.xlu1 %1044 }
 0x142   :  { %v1060_v59 = vsel %vm417_vm5, %v1045_v57, %v1047_v46  ;;  %1640 = vmatpush1.bf16.msra.mxu0 %v1135_v56 }
 0x143   :  { %1549 = vmatprep.subr.bf16.mxu1 %v1060_v59 }
 0x144   :  { %v408_v60 = vpop.permute.xlu0 %407 }
 0x145   :  { %v420_v61 = vsel %vm417_vm5, %v2381_v0, %v408_v60  ;;  %v1131_v54 = vpop.permute.xlu1 %1130 }
 0x146   :  { %1550 = vmatpush1.bf16.msra.mxu1 %v420_v61 }
 0x148   :  { %v1133_v62 = vpop.permute.xlu0 %1132 }
 0x149   :  { %v1129_v1 = vpop.permute.xlu1 %1128  ;;  %v1139_v2 = vsel %vm492_vm7, %v1131_v54, %v1133_v62 }
 0x14a   :  { %v1138_v3 = vsel %vm492_vm7, %v1129_v1, %v1131_v54  ;;  %1641 = vmatprep.subr.bf16.mxu0 %v1139_v2 }
 0x14b   :  { %1642 = vmatpush1.bf16.msra.mxu0 %v1138_v3 }
 0x14c   :  { %v1053_v5 = vpop.permute.xlu0 %1052 }
 0x14d   :  { %v416_v18 = vpop.permute.xlu1 %415  ;;  %v1063_v19 = vsel %vm417_vm5, %v1053_v5, %v1055_v20 }
 0x14e   :  { %v423_v29 = vsel %vm417_vm5, %v2405_v25, %v416_v18  ;;  %1551 = vmatprep.subr.bf16.mxu1 %v1063_v19 }
 0x14f   :  { %1552 = vmatpush1.bf16.msra.mxu1 %v423_v29 }
 0x150   :  { %v1197_v0 = vpop.permute.xlu0 %1196 }
 0x151   :  { %v1199_v21 = vpop.permute.xlu1 %1198 }
 0x152   :  { %v1210_v22 = vsel %vm567_vm8, %v1197_v0, %v1199_v21 }
 0x153   :  { %1643 = vmatprep.subr.bf16.mxu0 %v1210_v22 }
 0x154   :  { %v1195_v26 = vpop.permute.xlu0 %1194 }
 0x155   :  { %v1209_v27 = vsel %vm567_vm8, %v1195_v26, %v1197_v0  ;;  %v1119_v28 = vpop.permute.xlu1 %1118 }
 0x156   :  { %v1134_v8 = vsel %vm492_vm7, %v1119_v28, %v1121_v17  ;;  %1644 = vmatpush1.bf16.msra.mxu0 %v1209_v27 }
 0x157   :  { %1553 = vmatprep.subr.bf16.mxu1 %v1134_v8 }
 0x158   :  { %v483_v30 = vpop.permute.xlu0 %482 }
 0x159   :  { %v495_v32 = vsel %vm492_vm7, %v2430_v37, %v483_v30  ;;  %v1205_v25 = vpop.permute.xlu1 %1204 }
 0x15a   :  { %1554 = vmatpush1.bf16.msra.mxu1 %v495_v32 }
 0x15c   :  { %v1207_v34 = vpop.permute.xlu0 %1206 }
 0x15d   :  { %v1203_v33 = vpop.permute.xlu1 %1202  ;;  %v1213_v15 = vsel %vm567_vm8, %v1205_v25, %v1207_v34 }
 0x15e   :  { %v1212_v35 = vsel %vm567_vm8, %v1203_v33, %v1205_v25  ;;  %1645 = vmatprep.subr.bf16.mxu0 %v1213_v15 }
 0x15f   :  { %1646 = vmatpush1.bf16.msra.mxu0 %v1212_v35 }
 0x160   :  { %v1127_v36 = vpop.permute.xlu0 %1126 }
 0x161   :  { %v491_v38 = vpop.permute.xlu1 %490  ;;  %v1137_v40 = vsel %vm492_vm7, %v1127_v36, %v1129_v1 }
 0x162   :  { %v498_v41 = vsel %vm492_vm7, %v2455_v51, %v491_v38  ;;  %1555 = vmatprep.subr.bf16.mxu1 %v1137_v40  ;;  %1648 = vmatmul.mubr.bf16.vlgmr.msra.gmra.mrb[8].mxu0 %v2495_v4 }
 0x163   :  { %1556 = vmatpush1.bf16.msra.mxu1 %v498_v41  ;;  %1690 = vmatprep.mubr.bf16.mxu0 %v2051_v6 }
 0x164   :  { %v1193_v37 = vpop.permute.xlu0 %1192 }
 0x165   :  { %v558_v11 = vpop.permute.xlu1 %557  ;;  %v1208_v39 = vsel %vm567_vm8, %v1193_v37, %v1195_v26 }
 0x166   :  { %v570_v42 = vsel %vm567_vm8, %v2471_v58, %v558_v11  ;;  %1557 = vmatprep.subr.bf16.mxu1 %v1208_v39 }
 0x167   :  { %1558 = vmatpush1.bf16.msra.mxu1 %v570_v42 }
 0x168   :  { %v1271_v45 = vpop.permute.xlu0 %1270 }
 0x169   :  { %v1283_v46 = vsel %vm642_vm4, %v2417_v31, %v1271_v45  ;;  %v1273_v51 = vpop.permute.xlu1 %1272 }
 0x16a   :  { %v1284_v7 = vsel %vm642_vm4, %v1271_v45, %v1273_v51 }
 0x16b   :  { %1658 = vmatprep.subr.bf16.mxu0 %v1284_v7 }
 0x16c   :  { %1659 = vmatpush1.bf16.msra.mxu0 %v1283_v46  ;;  %v1201_v47 = vpop.permute.xlu0 %1200 }
 0x16d   :  { %v566_v6 = vpop.permute.xlu1 %565  ;;  %v1211_v48 = vsel %vm567_vm8, %v1201_v47, %v1203_v33 }
 0x16e   :  { %v573_v50 = vsel %vm567_vm8, %v2485_v63, %v566_v6  ;;  %1559 = vmatprep.subr.bf16.mxu1 %v1211_v48 }
 0x16f   :  { %1560 = vmatpush1.bf16.msra.mxu1 %v573_v50 }
 0x170   :  { %v1279_v58 = vpop.permute.xlu0 %1278 }
 0x171   :  { %v1286_v9 = vsel %vm642_vm4, %v2439_v43, %v1279_v58  ;;  %v1281_v44 = vpop.permute.xlu1 %1280 }
 0x172   :  { %1562 = vmatmul.mubr.bf16.vlgmr.msra.gmra.mrb[4].mxu1 %v2495_v4  ;;  %v1287_v31 = vsel %vm642_vm4, %v1279_v58, %v1281_v44 }
 0x173   :  { %1660 = vmatprep.subr.bf16.mxu0 %v1287_v31 }
 0x174   :  { %1661 = vmatpush1.bf16.msra.mxu0 %v1286_v9 }
 0x177   :  { %1947 = vmatmul.mubr.msk.bf16.vlgmr.msra.gmra.mrb[8].mxu0 %vm1439_vm6, %v2399_v23 }
 0x181   :  { %v1417_v24 = vpop.permute.xlu0 %1416 }
 0x182   :  { %v1422_v49 = vpop.permute.xlu1 %1421 }
 0x18c   :  { %v1520_v13 = vpop.f32.mrb[0].mxu0 }
 0x18d   :  { %v1522_v20 = vpop.f32.mrb[1].mxu0 }
 0x18e   :  { %v1524_v14 = vpop.f32.mrb[2].mxu0 }
 0x18f   :  { %v1526_v63 = vpop.f32.mrb[3].mxu0 }
 0x1a4   :  { %v1606_v10 = vpop.f32.mrb[4].mxu0 }
 0x1a5   :  { %v1608_v12 = vpop.f32.mrb[5].mxu0 }
 0x1a6   :  { %v1610_v52 = vpop.f32.mrb[6].mxu0 }
 0x1a7   :  { %v1612_v53 = vpop.f32.mrb[7].mxu0 }
 0x1b5   :  { %v1477_v43 = vpop.f32.mrb[0].mxu1 }
 0x1b6   :  { %v1479_v16 = vpop.f32.mrb[1].mxu1  ;;  %v1478_v4 = vadd.f32 %v1477_v43, %v1417_v24 }
 0x1b7   :  { %v1481_v55 = vpop.f32.mrb[2].mxu1  ;;  %v1480_v17 = vadd.f32 %v1479_v16, %v1417_v24 }
 0x1b8   :  { %v1521_v56 = vadd.f32 %v1520_v13, %v1478_v4  ;;  %v1483_v57 = vpop.f32.mrb[3].mxu1  ;;  %v1482_v59 = vadd.f32 %v1481_v55, %v1422_v49 }
 0x1b9   :  { %v1523_v60 = vadd.f32 %v1522_v20, %v1480_v17  ;;  %v1484_v23 = vadd.f32 %v1483_v57, %v1422_v49 }
 0x1ba   :  { %2021 = vtanh.f32 %v1521_v56  ;;  %v1525_v61 = vadd.f32 %v1524_v14, %v1482_v59 }
 0x1bb   :  { %2023 = vtanh.f32 %v1523_v60  ;;  %v1527_v54 = vadd.f32 %v1526_v63, %v1484_v23 }
 0x1bc   :  { %2025 = vtanh.f32 %v1525_v61 }
 0x1bd   :  { %2027 = vtanh.f32 %v1527_v54 }
 0x1c4   :  { %v2022_v62 = vpop.eup %2021 }
 0x1c5   :  { %v2024_v1 = vpop.eup %2023  ;;  %1713 = vst [vmem:[%s2667_s3] sm:$0xff] %v2022_v62 }
 0x1c6   :  { %v2026_v2 = vpop.eup %2025  ;;  %1714 = vst [vmem:[%s2667_s3 + $0x8] sm:$0xff] %v2024_v1 }
 0x1c7   :  { %v2028_v3 = vpop.eup %2027  ;;  %1716 = vst [vmem:[%s2667_s3 + $0x18] sm:$0xff] %v2026_v2 }
 0x1c8   :  { %1717 = vst [vmem:[%s2667_s3 + $0x20] sm:$0xff] %v2028_v3 }
 0x245   :  { %v1563_v5 = vpop.f32.mrb[4].mxu1 }
 0x246   :  { %v1564_v18 = vadd.f32 %v1563_v5, %v1417_v24  ;;  %v1565_v19 = vpop.f32.mrb[5].mxu1 }
 0x247   :  { %v1566_v29 = vadd.f32 %v1565_v19, %v1417_v24  ;;  %v1567_v0 = vpop.f32.mrb[6].mxu1 }
 0x248   :  { %v1607_v21 = vadd.f32 %v1606_v10, %v1564_v18  ;;  %v1568_v22 = vadd.f32 %v1567_v0, %v1422_v49  ;;  %v1569_v26 = vpop.f32.mrb[7].mxu1 }
 0x249   :  { %v1609_v27 = vadd.f32 %v1608_v12, %v1566_v29  ;;  %v1570_v28 = vadd.f32 %v1569_v26, %v1422_v49 }
 0x24a   :  { %2029 = vtanh.f32 %v1607_v21  ;;  %v1611_v8 = vadd.f32 %v1610_v52, %v1568_v22  ;;  %v1692_v30 = vpop.f32.mrb[8].mxu0 }
 0x24b   :  { %2031 = vtanh.f32 %v1609_v27  ;;  %v1613_v32 = vadd.f32 %v1612_v53, %v1570_v28  ;;  %v1970_v25 = vadd.f32 %v1692_v30, %v1417_v24  ;;  %v1694_v34 = vpop.f32.mrb[9].mxu0 }
 0x24c   :  { %2033 = vtanh.f32 %v1611_v8  ;;  %v1971_v33 = vadd.f32 %v1694_v34, %v1417_v24  ;;  %v1696_v15 = vpop.f32.mrb[10].mxu0 }
 0x24d   :  { %2035 = vtanh.f32 %v1613_v32  ;;  %v1972_v35 = vadd.f32 %v1696_v15, %v1422_v49  ;;  %v1698_v36 = vpop.f32.mrb[11].mxu0 }
 0x24e   :  { %2037 = vtanh.f32 %v1970_v25  ;;  %v1973_v38 = vadd.f32 %v1698_v36, %v1422_v49 }
 0x24f   :  { %2039 = vtanh.f32 %v1971_v33 }
 0x250   :  { %2041 = vtanh.f32 %v1972_v35 }
 0x251   :  { %2043 = vtanh.f32 %v1973_v38 }
 0x254   :  { %v2030_v40 = vpop.eup %2029 }
 0x255   :  { %v2032_v41 = vpop.eup %2031  ;;  %1715 = vst [vmem:[%s2667_s3 + $0x10] sm:$0xff] %v2030_v40 }
 0x256   :  { %v2034_v37 = vpop.eup %2033  ;;  %1948 = vst [vmem:[%s2667_s3 + $0x30] sm:$0xff] %v2032_v41 }
 0x257   :  { %v2036_v11 = vpop.eup %2035  ;;  %1718 = vst [vmem:[%s2667_s3 + $0x28] sm:$0xff] %v2034_v37 }
 0x258   :  { %v2038_v39 = vpop.eup %2037  ;;  %1951 = vst [vmem:[%s2667_s3 + $0x48] sm:$0xff] %v2036_v11 }
 0x259   :  { %v2040_v42 = vpop.eup %2039  ;;  %1949 = vst [vmem:[%s2667_s3 + $0x38] sm:$0xff] %v2038_v39 }
 0x25a   :  { %v2042_v45 = vpop.eup %2041  ;;  %1950 = vst [vmem:[%s2667_s3 + $0x40] sm:$0xff] %v2040_v42 }
 0x25b   :  { %v2044_v46 = vpop.eup %2043  ;;  %1952 = vst [vmem:[%s2667_s3 + $0x50] sm:$0xff] %v2042_v45 }
 0x25c   :  { %1953 = vst [vmem:[%s2667_s3 + $0x58] sm:$0xff] %v2044_v46 }

</bundles_post_ra>
